<compile_context>
chip_gen: v7x
topology: tpu7x:2x2x1
jax: 0.10.0
libtpu: 0.0.40
codegen_flags: <defaults>
</compile_context>

<pallas_src>
from functools import partial

import numpy as np
import jax
import jax.numpy as jnp
from jax.experimental import pallas as pl
from jax.experimental.pallas import tpu as pltpu


def _round_up(x, m):
    return (x + m - 1) // m * m


def _vmem_budget():
    """Physical VMEM minus ~15% headroom for compiler-internal scratch."""
    cap = 64 * 2 ** 20
    try:
        info = pltpu.get_tpu_info()
        cap = int(getattr(info, "vmem_capacity_bytes", cap))
    except Exception:
        pass
    return int(cap * 0.85)


def _rse_kernel(x_ref, wc_ref, mask_ref, w1_ref, b1_ref, w2_ref, b2_ref, o_ref,
                rhs_ref, pooled_ref, *, K, Wp, cin_p, l_tile, num_tiles, n_extra,
                wide, shortcut):
    # x_ref    : (1, T_in, cin_p, l_tile)   tile-major, zero-padded, flattened input (bf16)
    # wc_ref   : (Cout, K*K*cin_p)          conv weight, taps concatenated on the contraction dim
    # mask_ref : (T_out, 1, l_tile) f32     1/(H*W) on valid flat columns, 0 on pad/garbage
    # w1_ref   : (Cmid, Cout), b1_ref: (Cmid, 1)   SE reduce 1x1 conv
    # w2_ref   : (Cout, Cmid), b2_ref: (Cout, 1)   SE expand 1x1 conv
    # o_ref    : (1, T_out, Cout, l_tile)   output block; doubles as the two-pass staging buffer
    # rhs_ref  : (K*K*cin_p, l_tile)        per-tile grouped conv RHS (VMEM scratch)
    # pooled_ref: (Cout, 1) f32             running global-average-pool partial
    pooled_ref[...] = jnp.zeros_like(pooled_ref)

    def conv_tile(t):
        # Input window (tile + conv halo) gathered from tile-major chunks; only
        # leading-dim dynamic indexing -> plain addressing, no dynamic lane slicing.
        parts = [x_ref[0, t]]
        for i in range(1, n_extra + 1):
            w_i = min(l_tile, wide - i * l_tile)
            parts.append(x_ref[0, t + i][:, :w_i])
        xw = parts[0] if len(parts) == 1 else jnp.concatenate(parts, axis=-1)  # (cin_p, wide)

        # Grouped conv RHS: K*K statically-shifted copies stacked on the contraction dim.
        for ky in range(K):
            for kx in range(K):
                tap = ky * K + kx
                shift = ky * Wp + kx                              # static
                rhs_ref[pl.ds(tap * cin_p, cin_p), :] = xw[:, shift:shift + l_tile]

        # One fat MXU matmul per tile: contraction dim = K*K*cin_p, f32 accumulation.
        conv = jnp.dot(wc_ref[...], rhs_ref[...],
                       preferred_element_type=jnp.float32)        # (Cout, l_tile) f32

        # Global-average-pool partial: masked VPU multiply + lane reduce (keeps the MXU free).
        pooled_ref[...] += jnp.sum(conv * mask_ref[t], axis=1, keepdims=True)

        # Stage the unscaled conv tile in the (VMEM-resident) output block.
        o_ref[0, t] = conv.astype(o_ref.dtype)

    def scale_tile(t, scale):
        tile = o_ref[0, t].astype(jnp.float32) * scale
        o_ref[0, t] = tile.astype(o_ref.dtype)

    # ---- pass 1: conv tiles + pooled partial ----
    if num_tiles == 1:
        conv_tile(0)
    else:
        @pl.loop(0, num_tiles)
        def _(t):
            conv_tile(t)

    # ---- SE block (tiny, once per batch, all f32) ----
    pooled = pooled_ref[...]                                                   # (Cout, 1)
    h = jnp.dot(w1_ref[...], pooled, preferred_element_type=jnp.float32) + b1_ref[...]
    h = jnp.maximum(h, 0.0)                                                    # ReLU
    s = jnp.dot(w2_ref[...], h, preferred_element_type=jnp.float32) + b2_ref[...]
    att = jnp.clip(s + 3.0, 0.0, 6.0) * (1.0 / 6.0)                            # hardsigmoid
    # residual shortcut folded into the scale: conv + conv*att == conv*(att + 1)
    scale = att + 1.0 if shortcut else att                                     # (Cout, 1)

    # ---- pass 2: apply the SE scale to the staged conv tiles ----
    if num_tiles == 1:
        scale_tile(0, scale)
    else:
        @pl.loop(0, num_tiles)
        def _(t):
            scale_tile(t, scale)


@partial(jax.jit, static_argnames=("shortcut", "matmul_dtype", "out_dtype", "l_tile_hint"))
def rse_layer(x_nchw, conv_w, se_w1, se_b1, se_w2, se_b2, *, shortcut=True,
              matmul_dtype=jnp.bfloat16, out_dtype=jnp.bfloat16, l_tile_hint=512):
    """RSELayer forward.  x_nchw: (N, Cin, H, W).  Returns (N, Cout, H, W) in out_dtype."""
    N, Cin, H, W = x_nchw.shape
    Cout, _, K, _ = conv_w.shape
    Cmid = se_w1.shape[0]
    assert K % 2 == 1, "RSELayer kernel assumes an odd ('same') kernel size"
    p = K // 2
    Hp, Wp = H + 2 * p, W + 2 * p

    itm = jnp.dtype(matmul_dtype).itemsize
    otm = jnp.dtype(out_dtype).itemsize
    # pad Cin so every tap slab in the grouped RHS starts on a packed-sublane boundary
    cin_p = _round_up(Cin, 8 * max(1, 4 // itm))
    ck = K * K * cin_p

    # flattened-spatial geometry: output column q = h*Wp + w; tap shift = ky*Wp + kx
    halo = _round_up((K - 1) * (Wp + 1), 128)                 # max tap shift, 128-aligned
    l_tile = min(_round_up(l_tile_hint, 128), _round_up(H * Wp, 128))
    L_out = _round_up(H * Wp, l_tile)
    num_tiles = L_out // l_tile
    n_extra = -(-halo // l_tile)                              # extra input chunks per tile
    wide = halo + l_tile                                      # per-tile input window width
    T_in = num_tiles + n_extra
    L_in = T_in * l_tile

    # ---- glue (fused under jit): pad channels + spatial, flatten, tile-major layout ----
    x_pad = jnp.pad(x_nchw.astype(matmul_dtype),
                    ((0, 0), (0, cin_p - Cin), (p, p), (p, p)))          # (N, cin_p, Hp, Wp)
    x_flat = x_pad.reshape(N, cin_p, Hp * Wp)
    x_flat = jnp.pad(x_flat, ((0, 0), (0, 0), (0, L_in - Hp * Wp)))
    x_tiled = x_flat.reshape(N, cin_p, T_in, l_tile).transpose(0, 2, 1, 3)  # (N, T_in, cin_p, l_tile)

    # conv weight (Cout, Cin, K, K) -> (Cout, K*K*cin_p): taps concatenated on contraction dim
    wc = jnp.transpose(conv_w, (0, 2, 3, 1))                              # (Cout, K, K, Cin)
    wc = jnp.pad(wc, ((0, 0), (0, 0), (0, 0), (0, cin_p - Cin)))
    wc = wc.reshape(Cout, ck).astype(matmul_dtype)

    # pooling mask (trace-time constant): 1/(H*W) on valid flat columns, 0 elsewhere
    q = np.arange(L_out)
    valid = (q < H * Wp) & ((q % Wp) < W)
    maskv = jnp.asarray((valid.astype(np.float32) / float(H * W))
                        .reshape(num_tiles, 1, l_tile))

    # SE 1x1 conv weights (PyTorch OIHW) in f32
    w1 = se_w1.reshape(Cmid, Cout).astype(jnp.float32)
    b1 = se_b1.reshape(Cmid, 1).astype(jnp.float32)
    w2 = se_w2.reshape(Cout, Cmid).astype(jnp.float32)
    b2 = se_b2.reshape(Cout, 1).astype(jnp.float32)

    # cost / VMEM hints
    flops = 2 * N * L_out * ck * Cout + 4 * N * Cout * L_out + 4 * N * Cmid * Cout
    bytes_accessed = (N * T_in * cin_p * l_tile * itm + N * Cout * L_out * otm
                      + Cout * ck * itm + L_out * 4
                      + (Cmid * (Cout + 1) + Cout * (Cmid + 1)) * 4)
    cost = pl.CostEstimate(flops=int(flops), transcendentals=0,
                           bytes_accessed=int(bytes_accessed))

    vmem_need = (2 * T_in * cin_p * l_tile * itm        # double-buffered input block
                 + 2 * num_tiles * Cout * l_tile * otm  # double-buffered output block
                 + ck * l_tile * itm                    # grouped-RHS scratch
                 + cin_p * wide * itm                   # per-tile halo'd input window value
                 + 4 * Cout * l_tile * 4                # f32 conv tile + elementwise temps
                 + 2 * (Cout * ck * itm + L_out * 4
                        + (2 * Cmid * Cout + Cmid + Cout) * 4))
    vmem_limit = min(_vmem_budget(),
                     max(16 * 2 ** 20, int(1.25 * vmem_need) + (2 << 20)))

    kern = partial(_rse_kernel, K=K, Wp=Wp, cin_p=cin_p, l_tile=l_tile,
                   num_tiles=num_tiles, n_extra=n_extra, wide=wide, shortcut=shortcut)
    out_tiled = pl.pallas_call(
        kern,
        out_shape=jax.ShapeDtypeStruct((N, num_tiles, Cout, l_tile), out_dtype),
        grid_spec=pltpu.PrefetchScalarGridSpec(
            num_scalar_prefetch=0,
            grid=(N,),
            in_specs=[
                pl.BlockSpec((1, T_in, cin_p, l_tile), lambda n: (n, 0, 0, 0)),
                pl.BlockSpec((Cout, ck), lambda n: (0, 0)),
                pl.BlockSpec((num_tiles, 1, l_tile), lambda n: (0, 0, 0)),
                pl.BlockSpec((Cmid, Cout), lambda n: (0, 0)),
                pl.BlockSpec((Cmid, 1), lambda n: (0, 0)),
                pl.BlockSpec((Cout, Cmid), lambda n: (0, 0)),
                pl.BlockSpec((Cout, 1), lambda n: (0, 0)),
            ],
            out_specs=pl.BlockSpec((1, num_tiles, Cout, l_tile), lambda n: (n, 0, 0, 0)),
            scratch_shapes=[
                pltpu.VMEM((ck, l_tile), matmul_dtype),   # grouped conv RHS
                pltpu.VMEM((Cout, 1), jnp.float32),       # running pooled partial
            ],
        ),
        compiler_params=pltpu.CompilerParams(
            dimension_semantics=("parallel",),
            vmem_limit_bytes=int(vmem_limit),
        ),
        cost_estimate=cost,
    )(x_tiled, wc, maskv, w1, b1, w2, b2)

    # un-tile + drop the width-padding columns (q = h*Wp + w, keep w < W) -> NCHW.
    # Fused with the rest of the wrapper under jit; drop entirely if the consumer
    # can take the padded (N, Cout, H, Wp) layout.
    out_flat = out_tiled.transpose(0, 2, 1, 3).reshape(N, Cout, L_out)
    out = out_flat[:, :, :H * Wp].reshape(N, Cout, H, Wp)[:, :, :, :W]
    return out


def _reference(x_nchw, conv_w, se_w1, se_b1, se_w2, se_b2, shortcut=True):
    """Pure-JAX f32 reference matching the PyTorch module semantics."""
    dn = ("NCHW", "OIHW", "NCHW")
    conv = jax.lax.conv_general_dilated(x_nchw, conv_w, (1, 1), "SAME",
                                        dimension_numbers=dn)
    pooled = jnp.mean(conv, axis=(2, 3), keepdims=True)
    h = jax.lax.conv_general_dilated(pooled, se_w1, (1, 1), "VALID",
                                     dimension_numbers=dn) + se_b1[None, :, None, None]
    h = jnp.maximum(h, 0.0)
    s = jax.lax.conv_general_dilated(h, se_w2, (1, 1), "VALID",
                                     dimension_numbers=dn) + se_b2[None, :, None, None]
    att = jnp.clip(s + 3.0, 0.0, 6.0) / 6.0
    se = conv * att
    return conv + se if shortcut else se


if __name__ == "__main__":
    # RSELayer(in_channels=4, out_channels=8, kernel_size=3); SEModule default reduction = 4
    N, Cin, H, W = 2, 4, 16, 16
    Cout, K = 8, 3
    Cmid = max(1, Cout // 4)

    key = jax.random.PRNGKey(0)
    k0, k1, k2, k3, k4, k5 = jax.random.split(key, 6)
    x = jax.random.normal(k0, (N, Cin, H, W), jnp.float32)
    conv_w = 0.1 * jax.random.normal(k1, (Cout, Cin, K, K), jnp.float32)   # in_conv (no bias)
    se_w1 = 0.1 * jax.random.normal(k2, (Cmid, Cout, 1, 1), jnp.float32)   # SE reduce conv
    se_b1 = 0.1 * jax.random.normal(k3, (Cmid,), jnp.float32)
    se_w2 = 0.1 * jax.random.normal(k4, (Cout, Cmid, 1, 1), jnp.float32)   # SE expand conv
    se_b2 = 0.1 * jax.random.normal(k5, (Cout,), jnp.float32)

    # 1) default tile (single-tile path), shortcut=True
    out = rse_layer(x, conv_w, se_w1, se_b1, se_w2, se_b2, shortcut=True)
    out = jax.block_until_ready(out)
    assert out.shape == (N, Cout, H, W), out.shape
    ref = _reference(x, conv_w, se_w1, se_b1, se_w2, se_b2, shortcut=True)
    err = float(jnp.max(jnp.abs(out.astype(jnp.float32) - ref)))
    assert err < 5e-2, err   # bf16 operands + bf16 output vs f32 reference

    # 2) small tile (multi-tile pl.loop path), shortcut=False
    out2 = rse_layer(x, conv_w, se_w1, se_b1, se_w2, se_b2, shortcut=False,
                     l_tile_hint=128)
    out2 = jax.block_until_ready(out2)
    ref2 = _reference(x, conv_w, se_w1, se_b1, se_w2, se_b2, shortcut=False)
    err2 = float(jnp.max(jnp.abs(out2.astype(jnp.float32) - ref2)))
    assert err2 < 5e-2, err2

    print("KERNEL_OK")
</pallas_src>

<mosaic_0001>
module attributes {stable_mosaic.version = 11 : i64} {
  func.func @_rse_kernel(%arg0: i32, %arg1: memref<1x2x16x384xbf16, #tpu.memory_space<vmem>>, %arg2: memref<8x144xbf16, #tpu.memory_space<vmem>>, %arg3: memref<1x1x384xf32, #tpu.memory_space<vmem>>, %arg4: memref<2x8xf32, #tpu.memory_space<vmem>>, %arg5: memref<2x1xf32, #tpu.memory_space<vmem>>, %arg6: memref<8x2xf32, #tpu.memory_space<vmem>>, %arg7: memref<8x1xf32, #tpu.memory_space<vmem>>, %arg8: memref<1x1x8x384xbf16, #tpu.memory_space<vmem>>, %arg9: memref<144x384xbf16, #tpu.memory_space<vmem>>, %arg10: memref<8x1xf32, #tpu.memory_space<vmem>>) attributes {dimension_semantics = [#tpu.dimension_semantics<parallel>], iteration_bounds = array<i64: 2>, scalar_prefetch = 0 : i64, scratch_operands = 2 : i64, tpu.core_type = #tpu.core_type<tc>, window_params = [{transform_indices = @transform_0, window_bounds = array<i64: 1, 2, 16, 384>}, {pipeline_mode = #tpu.pipeline_mode<synchronous>, transform_indices = @transform_1, window_bounds = array<i64: 8, 144>}, {pipeline_mode = #tpu.pipeline_mode<synchronous>, transform_indices = @transform_2, window_bounds = array<i64: 1, 1, 384>}, {pipeline_mode = #tpu.pipeline_mode<synchronous>, transform_indices = @transform_3, window_bounds = array<i64: 2, 8>}, {pipeline_mode = #tpu.pipeline_mode<synchronous>, transform_indices = @transform_4, window_bounds = array<i64: 2, 1>}, {pipeline_mode = #tpu.pipeline_mode<synchronous>, transform_indices = @transform_5, window_bounds = array<i64: 8, 2>}, {pipeline_mode = #tpu.pipeline_mode<synchronous>, transform_indices = @transform_6, window_bounds = array<i64: 8, 1>}, {transform_indices = @transform_7, window_bounds = array<i64: 1, 1, 8, 384>}]} {
    %cst = arith.constant 0.000000e+00 : f32
    %0 = vector.broadcast %cst : f32 to vector<8x1xf32>
    %c0 = arith.constant 0 : index
    %c0_0 = arith.constant 0 : index
    %1 = vector.load %arg10[%c0, %c0_0] : memref<8x1xf32, #tpu.memory_space<vmem>>, vector<8x1xf32>
    tpu.vector_store %arg10[%c0, %c0_0], %0 {strides = array<i32>} : memref<8x1xf32, #tpu.memory_space<vmem>>, vector<8x1xf32>,
    %c0_1 = arith.constant 0 : index
    %c0_2 = arith.constant 0 : index
    %c0_3 = arith.constant 0 : index
    %c0_4 = arith.constant 0 : index
    %2 = vector.load %arg1[%c0_1, %c0_2, %c0_3, %c0_4] : memref<1x2x16x384xbf16, #tpu.memory_space<vmem>>, vector<1x1x16x384xbf16>
    %3 = vector.shape_cast %2 : vector<1x1x16x384xbf16> to vector<16x384xbf16>
    %c0_5 = arith.constant 0 : index
    %c1 = arith.constant 1 : index
    %c0_6 = arith.constant 0 : index
    %c0_7 = arith.constant 0 : index
    %4 = vector.load %arg1[%c0_5, %c1, %c0_6, %c0_7] : memref<1x2x16x384xbf16, #tpu.memory_space<vmem>>, vector<1x1x16x384xbf16>
    %5 = vector.shape_cast %4 : vector<1x1x16x384xbf16> to vector<16x384xbf16>
    %6 = vector.extract_strided_slice %5 {offsets = [0, 0], sizes = [16, 128], strides = [1, 1]} : vector<16x384xbf16> to vector<16x128xbf16>
    %7 = tpu.concatenate %3, %6 in 1 : vector<16x384xbf16>, vector<16x128xbf16> -> vector<16x512xbf16>
    %8 = vector.extract_strided_slice %7 {offsets = [0, 0], sizes = [16, 384], strides = [1, 1]} : vector<16x512xbf16> to vector<16x384xbf16>
    %c0_8 = arith.constant 0 : index
    %c0_9 = arith.constant 0 : index
    %9 = vector.load %arg9[%c0_8, %c0_9] : memref<144x384xbf16, #tpu.memory_space<vmem>>, vector<16x384xbf16>
    tpu.vector_store %arg9[%c0_8, %c0_9], %8 {strides = array<i32>} : memref<144x384xbf16, #tpu.memory_space<vmem>>, vector<16x384xbf16>,
    %10 = vector.extract_strided_slice %7 {offsets = [0, 1], sizes = [16, 384], strides = [1, 1]} : vector<16x512xbf16> to vector<16x384xbf16>
    %c16 = arith.constant 16 : index
    %c0_10 = arith.constant 0 : index
    %11 = vector.load %arg9[%c16, %c0_10] : memref<144x384xbf16, #tpu.memory_space<vmem>>, vector<16x384xbf16>
    tpu.vector_store %arg9[%c16, %c0_10], %10 {strides = array<i32>} : memref<144x384xbf16, #tpu.memory_space<vmem>>, vector<16x384xbf16>,
    %12 = vector.extract_strided_slice %7 {offsets = [0, 2], sizes = [16, 384], strides = [1, 1]} : vector<16x512xbf16> to vector<16x384xbf16>
    %c32 = arith.constant 32 : index
    %c0_11 = arith.constant 0 : index
    %13 = vector.load %arg9[%c32, %c0_11] : memref<144x384xbf16, #tpu.memory_space<vmem>>, vector<16x384xbf16>
    tpu.vector_store %arg9[%c32, %c0_11], %12 {strides = array<i32>} : memref<144x384xbf16, #tpu.memory_space<vmem>>, vector<16x384xbf16>,
    %14 = vector.extract_strided_slice %7 {offsets = [0, 18], sizes = [16, 384], strides = [1, 1]} : vector<16x512xbf16> to vector<16x384xbf16>
    %c48 = arith.constant 48 : index
    %c0_12 = arith.constant 0 : index
    %15 = vector.load %arg9[%c48, %c0_12] : memref<144x384xbf16, #tpu.memory_space<vmem>>, vector<16x384xbf16>
    tpu.vector_store %arg9[%c48, %c0_12], %14 {strides = array<i32>} : memref<144x384xbf16, #tpu.memory_space<vmem>>, vector<16x384xbf16>,
    %16 = vector.extract_strided_slice %7 {offsets = [0, 19], sizes = [16, 384], strides = [1, 1]} : vector<16x512xbf16> to vector<16x384xbf16>
    %c64 = arith.constant 64 : index
    %c0_13 = arith.constant 0 : index
    %17 = vector.load %arg9[%c64, %c0_13] : memref<144x384xbf16, #tpu.memory_space<vmem>>, vector<16x384xbf16>
    tpu.vector_store %arg9[%c64, %c0_13], %16 {strides = array<i32>} : memref<144x384xbf16, #tpu.memory_space<vmem>>, vector<16x384xbf16>,
    %18 = vector.extract_strided_slice %7 {offsets = [0, 20], sizes = [16, 384], strides = [1, 1]} : vector<16x512xbf16> to vector<16x384xbf16>
    %c80 = arith.constant 80 : index
    %c0_14 = arith.constant 0 : index
    %19 = vector.load %arg9[%c80, %c0_14] : memref<144x384xbf16, #tpu.memory_space<vmem>>, vector<16x384xbf16>
    tpu.vector_store %arg9[%c80, %c0_14], %18 {strides = array<i32>} : memref<144x384xbf16, #tpu.memory_space<vmem>>, vector<16x384xbf16>,
    %20 = vector.extract_strided_slice %7 {offsets = [0, 36], sizes = [16, 384], strides = [1, 1]} : vector<16x512xbf16> to vector<16x384xbf16>
    %c96 = arith.constant 96 : index
    %c0_15 = arith.constant 0 : index
    %21 = vector.load %arg9[%c96, %c0_15] : memref<144x384xbf16, #tpu.memory_space<vmem>>, vector<16x384xbf16>
    tpu.vector_store %arg9[%c96, %c0_15], %20 {strides = array<i32>} : memref<144x384xbf16, #tpu.memory_space<vmem>>, vector<16x384xbf16>,
    %22 = vector.extract_strided_slice %7 {offsets = [0, 37], sizes = [16, 384], strides = [1, 1]} : vector<16x512xbf16> to vector<16x384xbf16>
    %c112 = arith.constant 112 : index
    %c0_16 = arith.constant 0 : index
    %23 = vector.load %arg9[%c112, %c0_16] : memref<144x384xbf16, #tpu.memory_space<vmem>>, vector<16x384xbf16>
    tpu.vector_store %arg9[%c112, %c0_16], %22 {strides = array<i32>} : memref<144x384xbf16, #tpu.memory_space<vmem>>, vector<16x384xbf16>,
    %24 = vector.extract_strided_slice %7 {offsets = [0, 38], sizes = [16, 384], strides = [1, 1]} : vector<16x512xbf16> to vector<16x384xbf16>
    %c128 = arith.constant 128 : index
    %c0_17 = arith.constant 0 : index
    %25 = vector.load %arg9[%c128, %c0_17] : memref<144x384xbf16, #tpu.memory_space<vmem>>, vector<16x384xbf16>
    tpu.vector_store %arg9[%c128, %c0_17], %24 {strides = array<i32>} : memref<144x384xbf16, #tpu.memory_space<vmem>>, vector<16x384xbf16>,
    %c0_18 = arith.constant 0 : index
    %c0_19 = arith.constant 0 : index
    %26 = vector.load %arg2[%c0_18, %c0_19] : memref<8x144xbf16, #tpu.memory_space<vmem>>, vector<8x144xbf16>
    %c0_20 = arith.constant 0 : index
    %c0_21 = arith.constant 0 : index
    %27 = vector.load %arg9[%c0_20, %c0_21] : memref<144x384xbf16, #tpu.memory_space<vmem>>, vector<144x384xbf16>
    %cst_22 = arith.constant dense<0.000000e+00> : vector<8x384xf32>
    %28 = tpu.matmul %26, %27, %cst_22 {dimension_numbers = #tpu.dot_dimension_numbers<[1], [0], [0], [1], [0, 0, 1, 1], [], []>} : vector<8x144xbf16>, vector<144x384xbf16>, vector<8x384xf32> -> vector<8x384xf32>
    %c0_23 = arith.constant 0 : index
    %c0_24 = arith.constant 0 : index
    %29 = vector.load %arg10[%c0_23, %c0_24] : memref<8x1xf32, #tpu.memory_space<vmem>>, vector<8x1xf32>
    %c0_25 = arith.constant 0 : index
    %c0_26 = arith.constant 0 : index
    %c0_27 = arith.constant 0 : index
    %30 = vector.load %arg3[%c0_25, %c0_26, %c0_27] : memref<1x1x384xf32, #tpu.memory_space<vmem>>, vector<1x1x384xf32>
    %31 = vector.shape_cast %30 : vector<1x1x384xf32> to vector<1x384xf32>
    %32 = vector.broadcast %31 : vector<1x384xf32> to vector<8x384xf32>
    %33 = arith.mulf %28, %32 : vector<8x384xf32>
    %cst_28 = arith.constant dense<0.000000e+00> : vector<8xf32>
    %34 = vector.multi_reduction <add>, %33, %cst_28 [1] : vector<8x384xf32> to vector<8xf32>
    %35 = vector.shape_cast %34 : vector<8xf32> to vector<8x1xf32>
    %36 = arith.addf %29, %35 : vector<8x1xf32>
    %c0_29 = arith.constant 0 : index
    %c0_30 = arith.constant 0 : index
    %37 = vector.load %arg10[%c0_29, %c0_30] : memref<8x1xf32, #tpu.memory_space<vmem>>, vector<8x1xf32>
    tpu.vector_store %arg10[%c0_29, %c0_30], %36 {strides = array<i32>} : memref<8x1xf32, #tpu.memory_space<vmem>>, vector<8x1xf32>,
    %38 = arith.truncf %28 : vector<8x384xf32> to vector<8x384xbf16>
    %c0_31 = arith.constant 0 : index
    %c0_32 = arith.constant 0 : index
    %c0_33 = arith.constant 0 : index
    %c0_34 = arith.constant 0 : index
    %39 = vector.load %arg8[%c0_31, %c0_32, %c0_33, %c0_34] : memref<1x1x8x384xbf16, #tpu.memory_space<vmem>>, vector<1x1x8x384xbf16>
    %40 = vector.shape_cast %39 : vector<1x1x8x384xbf16> to vector<8x384xbf16>
    %41 = vector.shape_cast %38 : vector<8x384xbf16> to vector<1x1x8x384xbf16>
    tpu.vector_store %arg8[%c0_31, %c0_32, %c0_33, %c0_34], %41 {strides = array<i32>} : memref<1x1x8x384xbf16, #tpu.memory_space<vmem>>, vector<1x1x8x384xbf16>,
    %c0_35 = arith.constant 0 : index
    %c0_36 = arith.constant 0 : index
    %42 = vector.load %arg10[%c0_35, %c0_36] : memref<8x1xf32, #tpu.memory_space<vmem>>, vector<8x1xf32>
    %c0_37 = arith.constant 0 : index
    %c0_38 = arith.constant 0 : index
    %43 = vector.load %arg4[%c0_37, %c0_38] : memref<2x8xf32, #tpu.memory_space<vmem>>, vector<2x8xf32>
    %cst_39 = arith.constant dense<0.000000e+00> : vector<2x1xf32>
    %44 = tpu.matmul %43, %42, %cst_39 {dimension_numbers = #tpu.dot_dimension_numbers<[1], [0], [0], [1], [0, 0, 1, 1], [], []>} : vector<2x8xf32>, vector<8x1xf32>, vector<2x1xf32> -> vector<2x1xf32>
    %c0_40 = arith.constant 0 : index
    %c0_41 = arith.constant 0 : index
    %45 = vector.load %arg5[%c0_40, %c0_41] : memref<2x1xf32, #tpu.memory_space<vmem>>, vector<2x1xf32>
    %46 = arith.addf %44, %45 : vector<2x1xf32>
    %cst_42 = arith.constant 0.000000e+00 : f32
    %47 = vector.broadcast %cst_42 : f32 to vector<2x1xf32>
    %48 = arith.maximumf %46, %47 : vector<2x1xf32>
    %c0_43 = arith.constant 0 : index
    %c0_44 = arith.constant 0 : index
    %49 = vector.load %arg6[%c0_43, %c0_44] : memref<8x2xf32, #tpu.memory_space<vmem>>, vector<8x2xf32>
    %cst_45 = arith.constant dense<0.000000e+00> : vector<8x1xf32>
    %50 = tpu.matmul %49, %48, %cst_45 {dimension_numbers = #tpu.dot_dimension_numbers<[1], [0], [0], [1], [0, 0, 1, 1], [], []>} : vector<8x2xf32>, vector<2x1xf32>, vector<8x1xf32> -> vector<8x1xf32>
    %c0_46 = arith.constant 0 : index
    %c0_47 = arith.constant 0 : index
    %51 = vector.load %arg7[%c0_46, %c0_47] : memref<8x1xf32, #tpu.memory_space<vmem>>, vector<8x1xf32>
    %52 = arith.addf %50, %51 : vector<8x1xf32>
    %cst_48 = arith.constant 3.000000e+00 : f32
    %53 = vector.broadcast %cst_48 : f32 to vector<8x1xf32>
    %54 = arith.addf %52, %53 : vector<8x1xf32>
    %cst_49 = arith.constant 0.000000e+00 : f32
    %cst_50 = arith.constant 6.000000e+00 : f32
    %55 = vector.broadcast %cst_49 : f32 to vector<8x1xf32>
    %56 = arith.maximumf %55, %54 : vector<8x1xf32>
    %57 = vector.broadcast %cst_50 : f32 to vector<8x1xf32>
    %58 = arith.minimumf %57, %56 : vector<8x1xf32>
    %cst_51 = arith.constant 0.166666672 : f32
    %59 = vector.broadcast %cst_51 : f32 to vector<8x1xf32>
    %60 = arith.mulf %58, %59 : vector<8x1xf32>
    %cst_52 = arith.constant 1.000000e+00 : f32
    %61 = vector.broadcast %cst_52 : f32 to vector<8x1xf32>
    %62 = arith.addf %60, %61 : vector<8x1xf32>
    %c0_53 = arith.constant 0 : index
    %c0_54 = arith.constant 0 : index
    %c0_55 = arith.constant 0 : index
    %c0_56 = arith.constant 0 : index
    %63 = vector.load %arg8[%c0_53, %c0_54, %c0_55, %c0_56] : memref<1x1x8x384xbf16, #tpu.memory_space<vmem>>, vector<1x1x8x384xbf16>
    %64 = vector.shape_cast %63 : vector<1x1x8x384xbf16> to vector<8x384xbf16>
    %65 = arith.extf %64 : vector<8x384xbf16> to vector<8x384xf32>
    %66 = vector.broadcast %62 : vector<8x1xf32> to vector<8x384xf32>
    %67 = arith.mulf %65, %66 : vector<8x384xf32>
    %68 = arith.truncf %67 : vector<8x384xf32> to vector<8x384xbf16>
    %c0_57 = arith.constant 0 : index
    %c0_58 = arith.constant 0 : index
    %c0_59 = arith.constant 0 : index
    %c0_60 = arith.constant 0 : index
    %69 = vector.load %arg8[%c0_57, %c0_58, %c0_59, %c0_60] : memref<1x1x8x384xbf16, #tpu.memory_space<vmem>>, vector<1x1x8x384xbf16>
    %70 = vector.shape_cast %69 : vector<1x1x8x384xbf16> to vector<8x384xbf16>
    %71 = vector.shape_cast %68 : vector<8x384xbf16> to vector<1x1x8x384xbf16>
    tpu.vector_store %arg8[%c0_57, %c0_58, %c0_59, %c0_60], %71 {strides = array<i32>} : memref<1x1x8x384xbf16, #tpu.memory_space<vmem>>, vector<1x1x8x384xbf16>,
    return
  }
  func.func @transform_0(%arg0: i32) -> (i32, i32, i32, i32) {
    %c0_i32 = arith.constant 0 : i32
    %c0_i32_0 = arith.constant 0 : i32
    %c0_i32_1 = arith.constant 0 : i32
    %c0_i32_2 = arith.constant 0 : i32
    return %arg0, %c0_i32, %c0_i32_0, %c0_i32_1 : i32, i32, i32, i32
  }
  func.func @transform_1(%arg0: i32) -> (i32, i32) {
    %c0_i32 = arith.constant 0 : i32
    %c0_i32_0 = arith.constant 0 : i32
    %c0_i32_1 = arith.constant 0 : i32
    return %c0_i32, %c0_i32_0 : i32, i32
  }
  func.func @transform_2(%arg0: i32) -> (i32, i32, i32) {
    %c0_i32 = arith.constant 0 : i32
    %c0_i32_0 = arith.constant 0 : i32
    %c0_i32_1 = arith.constant 0 : i32
    %c0_i32_2 = arith.constant 0 : i32
    return %c0_i32, %c0_i32_0, %c0_i32_1 : i32, i32, i32
  }
  func.func @transform_3(%arg0: i32) -> (i32, i32) {
    %c0_i32 = arith.constant 0 : i32
    %c0_i32_0 = arith.constant 0 : i32
    %c0_i32_1 = arith.constant 0 : i32
    return %c0_i32, %c0_i32_0 : i32, i32
  }
  func.func @transform_4(%arg0: i32) -> (i32, i32) {
    %c0_i32 = arith.constant 0 : i32
    %c0_i32_0 = arith.constant 0 : i32
    %c0_i32_1 = arith.constant 0 : i32
    return %c0_i32, %c0_i32_0 : i32, i32
  }
  func.func @transform_5(%arg0: i32) -> (i32, i32) {
    %c0_i32 = arith.constant 0 : i32
    %c0_i32_0 = arith.constant 0 : i32
    %c0_i32_1 = arith.constant 0 : i32
    return %c0_i32, %c0_i32_0 : i32, i32
  }
  func.func @transform_6(%arg0: i32) -> (i32, i32) {
    %c0_i32 = arith.constant 0 : i32
    %c0_i32_0 = arith.constant 0 : i32
    %c0_i32_1 = arith.constant 0 : i32
    return %c0_i32, %c0_i32_0 : i32, i32
  }
  func.func @transform_7(%arg0: i32) -> (i32, i32, i32, i32) {
    %c0_i32 = arith.constant 0 : i32
    %c0_i32_0 = arith.constant 0 : i32
    %c0_i32_1 = arith.constant 0 : i32
    %c0_i32_2 = arith.constant 0 : i32
    return %arg0, %c0_i32, %c0_i32_0, %c0_i32_1 : i32, i32, i32, i32
  }
}

</mosaic_0001>

<bundles_post_ra>
// kernel: rse_layer.1
= control target key start
LH: loop header
LB: loop body
LE: loop exit
PB: predicated region body
PF: predicated region fallthrough
CT: control target
= control target key end

     0   :  { %s997_s24 = smov 0   ;;  %s1061_s0 = inlined_call_operand.vmem [shape: bf16[2,2,16,384], index: 0, kind: input, shape index: {}]   ;;  %s1062_s1 = inlined_call_operand.vmem [shape: bf16[8,144], index: 1, kind: input, shape index: {}]   ;;  %s1063_s2 = inlined_call_operand.vmem [shape: f32[1,1,384], index: 2, kind: input, shape index: {}]   ;;  %s1064_s3 = inlined_call_operand.vmem [shape: f32[2,8], index: 3, kind: input, shape index: {}]   ;;  %s1065_s4 = inlined_call_operand.vmem [shape: f32[2,1], index: 4, kind: input, shape index: {}]   ;;  %s1066_s5 = inlined_call_operand.vmem [shape: f32[8,2], index: 5, kind: input, shape index: {}]   ;;  %s1067_s6 = inlined_call_operand.vmem [shape: f32[8,1], index: 6, kind: input, shape index: {}]   ;;  %s1068_s7 = inlined_call_operand.vmem [shape: bf16[2,1,8,384], index: 7, kind: output, shape index: {}]  }
   0x1 LB: > { %s864_s25 = sadd.s32 4294967295, %s944_s24   ;;  %p868_p0 = scmp.ge.s32.totalorder %s944_s24, 1  ;;  %s944_s24 = sphi %s997_s24, %s17_s24  }
   0x2   : > { %p237_p1 = scmp.lt.s32.totalorder %s944_s24, 3 }
   0x4   : > { %p238_p2 = pnand %p868_p0, %p237_p1 }
   0x5   : > { %p269_p3 = scmp.lt.s32.totalorder (!%p238_p2), %s864_s25, 1  ;;  %v946_v0 = vmov (!%p238_p2), 0   ;;  %s947_s30 = smov (!%p238_p2), 127   ;;  %v1018_v5 = vld [vmem:[%s1062_s1] sm:$0xff] (!%p238_p2)  ;;  %vm491_vm0 = vcmask (!%p238_p2), 130048   ;;  %vm321_vm1 = vcmask (!%p238_p2), 1039360  }
   0x6   : > { %241 = sbr.rel (%p238_p2) target bundleno = 1143 (0x477), region = 48  ;;  %536 = vmatprep.subr.bf16.mxu1 (!%p238_p2), %v946_v0  ;;  %929 = vset.pattern.permute.xlu1 (!%p238_p2), %v946_v0  ;;  %s948_s8 = smov (!%p238_p2), 126   ;;  %v878_v6 = vcombine.high (!%p238_p2), %v1018_v5, %v1018_v5  ;;  %vm339_vm2 = vcmask (!%p238_p2), 1031168   ;;  %vm357_vm3 = vcmask (!%p238_p2), 900096   ;;  %vm375_vm4 = vcmask (!%p238_p2), 891904  }
   0x7   : > { %930 = vset.pattern.permute.xlu0 (!%p238_p2), %v946_v0  ;;  %s949_s9 = smov (!%p238_p2), 110   ;;  %s950_s10 = smov (!%p238_p2), 109   ;;  %vm393_vm5 = vcmask (!%p238_p2), 883712   ;;  %vm411_vm6 = vcmask (!%p238_p2), 752640   ;;  %vm429_vm7 = vcmask (!%p238_p2), 744448   ;;  %vm447_vm8 = vcmask (!%p238_p2), 736256  }
   0x8   : > { %s951_s11 = smov (!%p238_p2), 108   ;;  %s952_s12 = smov (!%p238_p2), 92   ;;  %879 = vmatprep.mubr.msk.bf16.mxu0 (!%p238_p2), %vm491_vm0, %v878_v6  ;;  %880 = vmatprep.mubr.msk.bf16.mxu1 (!%p238_p2), %vm491_vm0, %v878_v6  ;;  %v877_v62 = vcombine.low (!%p238_p2), %v1018_v5, %v1018_v5  ;;  %vm280_vm9 = vcmask (!%p238_p2), 7168   ;;  %vm956_vm10 = vmmov (!%p238_p2), 0   ;;  %vm621_vm11 = vcmask (!%p238_p2), 64512  }
   0x9   : > { %s953_s13 = smov (!%p238_p2), 91   ;;  %s954_s16 = smov (!%p238_p2), 90   ;;  %vm702_vm12 = vcmask (!%p238_p2), 1041408   ;;  %vm698_vm13 = vcmask (!%p238_p2), 15360  }
   0xd   : > { %s1070_s25 = smov (!%p269_p3, %s864_s25), 1 }
   0xe   : > { %s908_s26 = smul.u32 48, %s1070_s25 }
   0xf   : > { %s909_s19 = smul.u32 12, %s1070_s25 }
  0x10   : > { %s273_s29 = scalar_lea.vmem %s1061_s0, %s908_s26 }
  0x11   : > { %v931_v1 = vld [vmem:[%s273_s29 + $0x4] ss:$12 sps:$4 sm:$0xff]   ;;  %v933_v2 = vld [vmem:[%s273_s29] ss:$12 sps:$4 sm:$0xff]   ;;  %v934_v3 = vld [vmem:[%s273_s29 + $0x8] ss:$12 sps:$4 sm:$0xff]   ;;  %s1039_s22 = scalar_lea.vmem %s1068_s7, %s909_s19 }
  0x12   : > { %315 = vrot.lane.b32.xlu0 %v931_v1, %s947_s30  ;;  %495 = vmatprep.subr.bf16.mxu0 %v931_v1  ;;  %v935_v4 = vld [vmem:[%s273_s29 + $0x18] ss:$12 sps:$4 sm:$0xff]  }
  0x13   : > { %313 = vrot.lane.b32.xlu1 %v933_v2, %s947_s30  ;;  %496 = vmatpush1.bf16.msra.mxu0 %v933_v2 }
  0x14   : > { %537 = vmatpush1.bf16.msra.mxu1 %v934_v3 }
  0x15   : > { %538 = vmatprep.subr.bf16.mxu1 %v946_v0 }
  0x16   : > { %317 = vrot.lane.b32.xlu0 %v934_v3, %s947_s30 }
  0x17   : > { %319 = vrot.lane.b32.xlu1 %v935_v4, %s947_s30 }
  0x1a   : > { %333 = vrot.lane.b32.xlu0 %v931_v1, %s948_s8 }
  0x1b   : > { %335 = vrot.lane.b32.xlu1 %v934_v3, %s948_s8 }
  0x1e   : > { %331 = vrot.lane.b32.xlu0 %v933_v2, %s948_s8 }
  0x1f   : > { %337 = vrot.lane.b32.xlu1 %v935_v4, %s948_s8 }
  0x22   : > { %351 = vrot.lane.b32.xlu0 %v931_v1, %s949_s9 }
  0x23   : > { %353 = vrot.lane.b32.xlu1 %v934_v3, %s949_s9 }
  0x26   : > { %349 = vrot.lane.b32.xlu0 %v933_v2, %s949_s9 }
  0x27   : > { %355 = vrot.lane.b32.xlu1 %v935_v4, %s949_s9 }
  0x2a   : > { %369 = vrot.lane.b32.xlu0 %v931_v1, %s950_s10 }
  0x2b   : > { %371 = vrot.lane.b32.xlu1 %v934_v3, %s950_s10 }
  0x2e   : > { %367 = vrot.lane.b32.xlu0 %v933_v2, %s950_s10 }
  0x2f   : > { %373 = vrot.lane.b32.xlu1 %v935_v4, %s950_s10 }
  0x32   : > { %387 = vrot.lane.b32.xlu0 %v931_v1, %s951_s11 }
  0x33   : > { %389 = vrot.lane.b32.xlu1 %v934_v3, %s951_s11 }
  0x36   : > { %385 = vrot.lane.b32.xlu0 %v933_v2, %s951_s11 }
  0x37   : > { %391 = vrot.lane.b32.xlu1 %v935_v4, %s951_s11 }
  0x3a   : > { %405 = vrot.lane.b32.xlu0 %v931_v1, %s952_s12 }
  0x3b   : > { %407 = vrot.lane.b32.xlu1 %v934_v3, %s952_s12 }
  0x3e   : > { %403 = vrot.lane.b32.xlu0 %v933_v2, %s952_s12 }
  0x3f   : > { %409 = vrot.lane.b32.xlu1 %v935_v4, %s952_s12 }
  0x42   : > { %423 = vrot.lane.b32.xlu0 %v931_v1, %s953_s13 }
  0x43   : > { %425 = vrot.lane.b32.xlu1 %v934_v3, %s953_s13 }
  0x46   : > { %421 = vrot.lane.b32.xlu0 %v933_v2, %s953_s13 }
  0x47   : > { %427 = vrot.lane.b32.xlu1 %v935_v4, %s953_s13 }
  0x4a   : > { %441 = vrot.lane.b32.xlu0 %v931_v1, %s954_s16  ;;  %v955_v1 = vmov 0.0  }
  0x4b   : > { %443 = vrot.lane.b32.xlu1 %v934_v3, %s954_s16  ;;  %281 = vst.msk [vmem:[#allocation3] sm:$0xff] %vm280_vm9, %v955_v1 }
  0x4e   : > { %439 = vrot.lane.b32.xlu0 %v933_v2, %s954_s16 }
  0x4f   : > { %445 = vrot.lane.b32.xlu1 %v935_v4, %s954_s16  ;;  %v577_v4 = vld [vmem:[%s1063_s2] sm:$0x7] }
  0x84   : > { %v316_v7 = vpop.permute.xlu0 %315 }
  0x85   : > { %v314_v8 = vpop.permute.xlu1 %313 }
  0x86   : > { %v322_v13 = vsel %vm321_vm1, %v314_v8, %v316_v7 }
  0x88   : > { %v318_v9 = vpop.permute.xlu0 %317 }
  0x89   : > { %v320_v10 = vpop.permute.xlu1 %319  ;;  %v323_v11 = vsel %vm321_vm1, %v316_v7, %v318_v9 }
  0x8a   : > { %497 = vmatprep.subr.bf16.mxu0 %v323_v11  ;;  %v324_v12 = vsel %vm321_vm1, %v318_v9, %v320_v10 }
  0x8b   : > { %539 = vmatpush1.bf16.msra.mxu1 %v324_v12  ;;  %498 = vmatpush1.bf16.msra.mxu0 %v322_v13 }
  0x8c   : > { %v334_v14 = vpop.permute.xlu0 %333  ;;  %540 = vmatprep.subr.bf16.mxu1 %v946_v0 }
  0x8d   : > { %v336_v15 = vpop.permute.xlu1 %335 }
  0x8e   : > { %v341_v16 = vsel %vm339_vm2, %v334_v14, %v336_v15 }
  0x8f   : > { %499 = vmatprep.subr.bf16.mxu0 %v341_v16 }
  0x90   : > { %v332_v17 = vpop.permute.xlu0 %331 }
  0x91   : > { %v338_v18 = vpop.permute.xlu1 %337  ;;  %v340_v19 = vsel %vm339_vm2, %v332_v17, %v334_v14 }
  0x92   : > { %500 = vmatpush1.bf16.msra.mxu0 %v340_v19  ;;  %v342_v20 = vsel %vm339_vm2, %v336_v15, %v338_v18 }
  0x93   : > { %541 = vmatpush1.bf16.msra.mxu1 %v342_v20 }
  0x94   : > { %v352_v21 = vpop.permute.xlu0 %351  ;;  %542 = vmatprep.subr.bf16.mxu1 %v946_v0 }
  0x95   : > { %v354_v22 = vpop.permute.xlu1 %353 }
  0x96   : > { %v359_v23 = vsel %vm357_vm3, %v352_v21, %v354_v22 }
  0x97   : > { %501 = vmatprep.subr.bf16.mxu0 %v359_v23 }
  0x98   : > { %v350_v24 = vpop.permute.xlu0 %349 }
  0x99   : > { %v356_v25 = vpop.permute.xlu1 %355  ;;  %v358_v26 = vsel %vm357_vm3, %v350_v24, %v352_v21 }
  0x9a   : > { %502 = vmatpush1.bf16.msra.mxu0 %v358_v26  ;;  %v360_v27 = vsel %vm357_vm3, %v354_v22, %v356_v25  ;;  %v576_v25 = vld [vmem:[#allocation3] sm:$0xff] }
  0x9b   : > { %543 = vmatpush1.bf16.msra.mxu1 %v360_v27 }
  0x9c   : > { %v370_v28 = vpop.permute.xlu0 %369  ;;  %544 = vmatprep.subr.bf16.mxu1 %v946_v0 }
  0x9d   : > { %v372_v29 = vpop.permute.xlu1 %371 }
  0x9e   : > { %v377_v30 = vsel %vm375_vm4, %v370_v28, %v372_v29 }
  0x9f   : > { %503 = vmatprep.subr.bf16.mxu0 %v377_v30  ;;  %v620_v30 = vld [vmem:[%s1065_s4] sm:$0x3] }
  0xa0   : > { %v368_v31 = vpop.permute.xlu0 %367 }
  0xa1   : > { %v374_v32 = vpop.permute.xlu1 %373  ;;  %v376_v33 = vsel %vm375_vm4, %v368_v31, %v370_v28  ;;  %v619_v28 = vld [vmem:[%s1064_s3] sm:$0x3] }
  0xa2   : > { %504 = vmatpush1.bf16.msra.mxu0 %v376_v33  ;;  %v378_v34 = vsel %vm375_vm4, %v372_v29, %v374_v32 }
  0xa3   : > { %545 = vmatpush1.bf16.msra.mxu1 %v378_v34 }
  0xa4   : > { %v388_v35 = vpop.permute.xlu0 %387  ;;  %546 = vmatprep.subr.bf16.mxu1 %v946_v0 }
  0xa5   : > { %v390_v36 = vpop.permute.xlu1 %389 }
  0xa6   : > { %v395_v37 = vsel %vm393_vm5, %v388_v35, %v390_v36 }
  0xa7   : > { %505 = vmatprep.subr.bf16.mxu0 %v395_v37 }
  0xa8   : > { %v386_v38 = vpop.permute.xlu0 %385 }
  0xa9   : > { %v392_v39 = vpop.permute.xlu1 %391  ;;  %v394_v40 = vsel %vm393_vm5, %v386_v38, %v388_v35  ;;  %v696_v35 = vld [vmem:[%s1066_s5] sm:$0xff] }
  0xaa   : > { %506 = vmatpush1.bf16.msra.mxu0 %v394_v40  ;;  %v396_v41 = vsel %vm393_vm5, %v390_v36, %v392_v39  ;;  %v697_v36 = vld [vmem:[%s1067_s6] sm:$0xff] }
  0xab   : > { %547 = vmatpush1.bf16.msra.mxu1 %v396_v41 }
  0xac   : > { %v406_v42 = vpop.permute.xlu0 %405  ;;  %548 = vmatprep.subr.bf16.mxu1 %v946_v0 }
  0xad   : > { %v408_v43 = vpop.permute.xlu1 %407 }
  0xae   : > { %v413_v44 = vsel %vm411_vm6, %v406_v42, %v408_v43 }
  0xaf   : > { %507 = vmatprep.subr.bf16.mxu0 %v413_v44 }
  0xb0   : > { %v404_v45 = vpop.permute.xlu0 %403 }
  0xb1   : > { %v410_v46 = vpop.permute.xlu1 %409  ;;  %v412_v47 = vsel %vm411_vm6, %v404_v45, %v406_v42 }
  0xb2   : > { %508 = vmatpush1.bf16.msra.mxu0 %v412_v47  ;;  %v414_v48 = vsel %vm411_vm6, %v408_v43, %v410_v46 }
  0xb3   : > { %549 = vmatpush1.bf16.msra.mxu1 %v414_v48 }
  0xb4   : > { %v424_v49 = vpop.permute.xlu0 %423  ;;  %550 = vmatprep.subr.bf16.mxu1 %v946_v0 }
  0xb5   : > { %v426_v50 = vpop.permute.xlu1 %425 }
  0xb6   : > { %v431_v51 = vsel %vm429_vm7, %v424_v49, %v426_v50 }
  0xb7   : > { %509 = vmatprep.subr.bf16.mxu0 %v431_v51 }
  0xb8   : > { %v422_v52 = vpop.permute.xlu0 %421 }
  0xb9   : > { %v428_v53 = vpop.permute.xlu1 %427  ;;  %v430_v54 = vsel %vm429_vm7, %v422_v52, %v424_v49 }
  0xba   : > { %510 = vmatpush1.bf16.msra.mxu0 %v430_v54  ;;  %v432_v55 = vsel %vm429_vm7, %v426_v50, %v428_v53 }
  0xbb   : > { %551 = vmatpush1.bf16.msra.mxu1 %v432_v55 }
  0xbc   : > { %v442_v56 = vpop.permute.xlu0 %441  ;;  %552 = vmatprep.subr.bf16.mxu1 %v946_v0  ;;  %v579_v0 = vlaneseq }
  0xbd   : > { %v444_v57 = vpop.permute.xlu1 %443 }
  0xbe   : > { %v449_v58 = vsel %vm447_vm8, %v442_v56, %v444_v57  ;;  %v580_v2 = vshrl.u32 %v579_v0, 7 }
  0xbf   : > { %511 = vmatprep.subr.bf16.mxu0 %v449_v58 }
  0xc0   : > { %v440_v59 = vpop.permute.xlu0 %439  ;;  %v581_v3 = vsub.s32 0, %v580_v2  ;;  %v589_v5 = vsub.s32 2, %v580_v2  ;;  %v585_v6 = vsub.s32 1, %v580_v2 }
  0xc1   : > { %v446_v60 = vpop.permute.xlu1 %445  ;;  %v448_v61 = vsel %vm447_vm8, %v440_v59, %v442_v56 }
  0xc2   : > { %512 = vmatpush1.bf16.msra.mxu0 %v448_v61  ;;  %v450_v63 = vsel %vm447_vm8, %v444_v57, %v446_v60  ;;  %v582_v7 = vrot.slane %v577_v4, %v581_v3  ;;  %v590_v8 = vrot.slane %v577_v4, %v589_v5  ;;  %v586_v9 = vrot.slane %v577_v4, %v585_v6 }
  0xc3   : > { %553 = vmatpush1.bf16.msra.mxu1 %v450_v63  ;;  %898 = vmatprep.subr.mxu0 %v955_v1 }
  0xc4   : > { %903 = vmatprep.subr.mxu1 %v955_v1 }
  0xc5   : > { %528 = vmatmul.mubr.bf16.vlgmr.msra.gmra.mrb[0].mxu0 %v877_v62 }
  0xc6   : > { %569 = vmatmul.mubr.bf16.vlgmr.msra.gmra.mrb[0].mxu1 %v877_v62  ;;  %900 = vmatprep.mubr.msk.f32.mxu0 %vm956_vm10, %v955_v1 }
  0xc7   : > { %905 = vmatprep.mubr.msk.f32.mxu1 %vm956_vm10, %v955_v1 }
 0x198   : > { %v529_v10 = vpop.f32.mrb[0].mxu0 }
 0x199   : > { %v594_v11 = vmul.f32 %v582_v7, %v529_v10  ;;  %v570_v12 = vpop.f32.mrb[0].mxu1  ;;  %v531_v13 = vpop.f32.mrb[1].mxu0 }
 0x19a   : > { %v596_v14 = vmul.f32 %v590_v8, %v570_v12  ;;  %v891_v15 = vpack.c.bf16 %v570_v12, %v570_v12  ;;  %v595_v16 = vmul.f32 %v586_v9, %v531_v13  ;;  %v890_v17 = vpack.c.bf16 %v531_v13, %v529_v10  ;;  %v572_v18 = vpop.f32.mrb[1].mxu1  ;;  %v533_v19 = vpop.f32.mrb[2].mxu0 }
 0x19b   : > { %v573_v20 = vpop.f32.mrb[2].mxu1  ;;  %v534_v21 = vpop.f32.mrb[3].mxu0 }
 0x19c   : > { %617 = vst [vmem:[%s1039_s22 + $0x8] sm:$0xf] %v891_v15  ;;  %v574_v22 = vpop.f32.mrb[3].mxu1  ;;  %v597_v23 = vadd.f32 %v595_v16, %v594_v11  ;;  %v783_v46 = vunpack.c.l.bf16 %v890_v17  ;;  %v784_v47 = vunpack.c.h.bf16 %v890_v17 }
 0x19e   : > { %v598_v24 = vadd.f32 %v597_v23, %v596_v14 }
 0x1a0   : > { %599 = vadd.xlane.f32.xlu0 %v598_v24 }
 0x1a3   : > { %v782_v45 = vld [vmem:[%s1039_s22 + $0x8] sm:$0xf] }
 0x1a4   : > { %v785_v48 = vunpack.c.l.bf16 %v782_v45 }
 0x22d   : > { %v600_v26 = vpop.xlane.xlu0 %599 }
 0x22e   : > { %v601_v27 = vadd.f32 %v600_v26, %v576_v25 }
 0x230   : > { %602 = vst.msk [vmem:[#allocation3] sm:$0xff] %vm280_vm9, %v601_v27 }
 0x237   : > { %v618_v29 = vld [vmem:[#allocation3] sm:$0xff] }
 0x238   : > { %899 = vmatpush3.msra.mxu0 %v618_v29 }
 0x239   : > { %901 = vmatmul.mubr.msk.f32.vlgmr.msra.gmra.mrb[4].mxu0 %vm621_vm11, %v619_v28 }
 0x30c   : > { %v691_v31 = vpop.f32.mrb[4].mxu0 }
 0x30d   : > { %v692_v32 = vadd.f32 %v691_v31, %v620_v30  ;;  %v902_v33 = vpop.f32.mrb[5].mxu0 }
 0x30f   : > { %v695_v34 = vmax.f32 %v692_v32, 0.0 }
 0x311   : > { %904 = vmatpush3.msk.msra.mxu1 %vm702_vm12, %v695_v34 }
 0x312   : > { %906 = vmatmul.mubr.msk.f32.vlgmr.msra.gmra.mrb[4].mxu1 %vm698_vm13, %v696_v35 }
 0x3e5   : > { %v772_v37 = vpop.f32.mrb[4].mxu1 }
 0x3e6   : > { %v773_v38 = vadd.f32 %v772_v37, %v697_v36  ;;  %v907_v39 = vpop.f32.mrb[5].mxu1 }
 0x3e8   : > { %v776_v40 = vadd.f32 3.0, %v773_v38 }
 0x3ea   : > { %v777_v41 = vmax.f32 %v776_v40, 0.0 }
 0x3ec   : > { %v778_v42 = vmin.f32 %v777_v41, 6.0 }
 0x3ee   : > { %v779_v43 = vmul.f32 0.16666667, %v778_v42 }
 0x3f0   : > { %v780_v44 = vadd.f32 1.0, %v779_v43 }
 0x3f2   : > { %788 = vperm.xlu1 %929, %v780_v44  }
 0x471   : > { %v789_v49 = vpop.permute.xlu1 %788 }
 0x472   : > { %v791_v50 = vmul.f32 %v789_v49, %v783_v46  ;;  %v792_v51 = vmul.f32 %v789_v49, %v784_v47  ;;  %v793_v52 = vmul.f32 %v789_v49, %v785_v48 }
 0x474   : > { %v892_v53 = vpack.c.bf16 %v792_v51, %v791_v50  ;;  %v893_v54 = vpack.c.bf16 %v793_v52, %v793_v52 }
 0x476   : > { %807 = vst [vmem:[%s1039_s22] sm:$0xff] %v892_v53  ;;  %808 = vst [vmem:[%s1039_s22 + $0x8] sm:$0xf] %v893_v54 }
 0x477 PF: > { %s17_s24 = sadd.s32 1, %s944_s24  }
 0x478   : > { %p14_p4 = scmp.ge.s32.totalorder %s17_s24, 4  }
 0x47a   :  { %16 = sbr.rel (!%p14_p4) target bundleno = 1 (0x1), region = 79 }

</bundles_post_ra>
